<compile_context>
chip_gen: v7x
topology: tpu7x:2x2x1
jax: 0.10.0
libtpu: 0.0.40
codegen_flags: <defaults>
</compile_context>

<pallas_src>
import math

import jax
import jax.numpy as jnp
from jax.experimental import pallas as pl
from jax.experimental.pallas import tpu as pltpu


_LANE = 128
_SUBLANE = 8
_TILE = 256  # tiled-path pad granularity (matches 256-wide MXU on v6e/v7x)


def _round_up(x, m):
    return ((x + m - 1) // m) * m


def _vmem_capacity_bytes():
    """Physical VMEM per TensorCore; conservative (v7x-sized) fallback."""
    try:
        info = pltpu.get_tpu_info()
        cap = getattr(info, "vmem_capacity_bytes", None)
        if cap:
            return int(cap)
    except Exception:
        pass
    return 64 * 1024 * 1024


def _batch_tile(batch):
    """Batch tile size for both paths (multiple of 8; 256 for big batches)."""
    if batch >= 256:
        return 256
    return _round_up(max(batch, _SUBLANE), _SUBLANE)


# ---------------------------------------------------------------------------
# Fused whole-MLP kernel (small / medium hidden dims)
# ---------------------------------------------------------------------------
def _make_fused_kernel(num_layers):
    L = num_layers

    def kernel(*refs):
        # refs = (x_ref, w0, b0, ..., w_{L-1}, b_{L-1}, o_ref)
        x_ref = refs[0]
        wb = refs[1:1 + 2 * L]
        o_ref = refs[1 + 2 * L]

        h = x_ref[...]                          # (tm, d0_pad) f32
        for i in range(L):
            w = wb[2 * i][...]                  # (in_pad, out_pad) bf16, pre-transposed
            b = wb[2 * i + 1][...]              # (1, out_pad) f32
            # bf16 MXU matmul, f32 accumulation; bias add in f32.
            h = jnp.dot(h.astype(jnp.bfloat16), w,
                        preferred_element_type=jnp.float32) + b
        o_ref[...] = h.astype(o_ref.dtype)

    return kernel


# ---------------------------------------------------------------------------
# Tiled per-layer kernel (fallback for large hidden dims)
# ---------------------------------------------------------------------------
def _tiled_linear_kernel(x_ref, w_ref, b_ref, o_ref, acc_ref):
    @pl.when(pl.program_id(2) == 0)
    def _():
        acc_ref[...] = jnp.zeros_like(acc_ref)

    acc_ref[...] += jnp.dot(x_ref[...], w_ref[...],
                            preferred_element_type=jnp.float32)

    @pl.when(pl.program_id(2) == pl.num_programs(2) - 1)
    def _():
        o_ref[...] = (acc_ref[...] + b_ref[...]).astype(o_ref.dtype)


def _tiled_linear(x_pad, wt_pad, bias2d, *, tm, tn, tk, out_dtype, vmem_limit):
    """y = x_pad @ wt_pad + bias.  All operands pre-padded to tile multiples."""
    Mp, Kp = x_pad.shape
    Kw, Np = wt_pad.shape
    assert Kw == Kp and Mp % tm == 0 and Np % tn == 0 and Kp % tk == 0

    grid = (Mp // tm, Np // tn, Kp // tk)
    out_itemsize = jnp.dtype(out_dtype).itemsize
    flops = 2 * Mp * Np * Kp
    bytes_accessed = (Mp * Kp + Kp * Np) * 2 + Np * 4 + Mp * Np * out_itemsize

    return pl.pallas_call(
        _tiled_linear_kernel,
        out_shape=jax.ShapeDtypeStruct((Mp, Np), out_dtype),
        grid=grid,
        in_specs=[
            pl.BlockSpec((tm, tk), lambda i, j, k: (i, k)),
            pl.BlockSpec((tk, tn), lambda i, j, k: (k, j)),
            pl.BlockSpec((1, tn), lambda i, j, k: (0, j)),
        ],
        out_specs=pl.BlockSpec((tm, tn), lambda i, j, k: (i, j)),
        scratch_shapes=[pltpu.VMEM((tm, tn), jnp.float32)],
        compiler_params=pltpu.CompilerParams(
            dimension_semantics=("parallel", "parallel", "arbitrary"),
            vmem_limit_bytes=vmem_limit),
        cost_estimate=pl.CostEstimate(
            flops=int(flops), transcendentals=0,
            bytes_accessed=int(bytes_accessed)),
    )(x_pad, wt_pad, bias2d)


# ---------------------------------------------------------------------------
# MLP wrapper
# ---------------------------------------------------------------------------
class MLP:
    """Sequential stack of Linear layers (no activations), Pallas-backed."""

    def __init__(self, hidden_dim, key):
        self._hidden_dim = tuple(int(d) for d in hidden_dim)
        self._num_layers = len(self._hidden_dim) - 1
        self._dims_pad = tuple(_round_up(d, _LANE) for d in self._hidden_dim)

        # Generation-aware VMEM policy.
        cap = _vmem_capacity_bytes()
        if cap >= 100 * 1024 * 1024:                 # v5e / v6e: 128 MiB physical
            self._fused_budget = 88 * 1024 * 1024
            self._vmem_limit_bytes = 96 * 1024 * 1024
        else:                                        # v7x: 64 MiB per TensorCore
            self._fused_budget = 36 * 1024 * 1024
            self._vmem_limit_bytes = 48 * 1024 * 1024

        self.params = []    # original torch-layout (OUT, IN)/(OUT,) f32 (reference)
        self._packed = []   # fused path: bf16 (IN_pad, OUT_pad), f32 (1, OUT_pad)
        for i in range(1, self._num_layers + 1):
            fan_in = self._hidden_dim[i - 1]
            fan_out = self._hidden_dim[i]
            key, kw, kb = jax.random.split(key, 3)
            bound = 1.0 / math.sqrt(fan_in)
            # Deterministic init mirroring torch.nn.Linear's default U(-k, k)
            w = jax.random.uniform(kw, (fan_out, fan_in), jnp.float32,
                                   minval=-bound, maxval=bound)
            b = jax.random.uniform(kb, (fan_out,), jnp.float32,
                                   minval=-bound, maxval=bound)
            self.params.append((w, b))

            in_p, out_p = self._dims_pad[i - 1], self._dims_pad[i]
            wt = jnp.zeros((in_p, out_p), jnp.bfloat16)
            wt = wt.at[:fan_in, :fan_out].set(w.T.astype(jnp.bfloat16))
            bp = jnp.zeros((1, out_p), jnp.float32).at[0, :fan_out].set(b)
            self._packed.append((wt, bp))

        # Lazily built, cached, tile-aligned packing for the tiled fallback.
        self._tiled_packed = None
        self._tiled_dims = None
        # None = unknown, True/False once probed (pl.Buffered(1) support).
        self._use_buffered_weights = None

    # -- path selection -----------------------------------------------------
    def _fused_fits(self, batch):
        if self._num_layers == 0:
            return True
        tm = _batch_tile(batch)
        w_bytes = sum(int(w.size) * 2 + int(b.size) * 4 for w, b in self._packed)
        io_bytes = 2 * tm * (self._dims_pad[0] + self._dims_pad[-1]) * 4  # dbl-buffered x/out
        act_bytes = tm * sum(self._dims_pad) * 4                          # f32 intermediates
        # 1.5x on weights: headroom in case single-buffering is unavailable.
        return int(w_bytes * 1.5) + io_bytes + act_bytes <= self._fused_budget

    # -- fused forward ------------------------------------------------------
    def _forward_fused(self, x):
        B, IN = x.shape
        dims_pad = self._dims_pad
        L = self._num_layers

        tm = _batch_tile(B)
        b_pad = _round_up(max(B, _SUBLANE), tm)
        x_pad = jnp.zeros((b_pad, dims_pad[0]), x.dtype).at[:B, :IN].set(x)

        kernel = _make_fused_kernel(L)

        operands = [x_pad]
        flops = 0
        bytes_accessed = int(x_pad.size) * 4 + b_pad * dims_pad[-1] * 4
        for wt, bp in self._packed:
            operands += [wt, bp]
            flops += 2 * b_pad * int(wt.shape[0]) * int(wt.shape[1])
            bytes_accessed += int(wt.size) * 2 + int(bp.size) * 4

        def build_in_specs(weight_pipeline_mode):
            specs = [pl.BlockSpec((tm, dims_pad[0]), lambda i: (i, 0))]
            for wt, bp in self._packed:
                kwargs = {}
                if weight_pipeline_mode is not None:
                    kwargs["pipeline_mode"] = weight_pipeline_mode
                specs.append(pl.BlockSpec(wt.shape, lambda i: (0, 0), **kwargs))
                specs.append(pl.BlockSpec(bp.shape, lambda i: (0, 0), **kwargs))
            return specs

        out_shape = jax.ShapeDtypeStruct((b_pad, dims_pad[-1]), x.dtype)
        out_specs = pl.BlockSpec((tm, dims_pad[-1]), lambda i: (i, 0))
        cparams = pltpu.CompilerParams(
            dimension_semantics=("parallel",),
            vmem_limit_bytes=self._vmem_limit_bytes)
        cost = pl.CostEstimate(flops=int(flops), transcendentals=0,
                               bytes_accessed=int(bytes_accessed))

        modes = []
        if self._use_buffered_weights in (None, True):
            modes.append("buffered")
        if self._use_buffered_weights in (None, False):
            modes.append("default")

        last_exc = None
        for mode in modes:
            try:
                pm = pl.Buffered(1) if mode == "buffered" else None
                out = pl.pallas_call(
                    kernel,
                    out_shape=out_shape,
                    grid=(b_pad // tm,),
                    in_specs=build_in_specs(pm),
                    out_specs=out_specs,
                    compiler_params=cparams,
                    cost_estimate=cost,
                )(*operands)
                out = jax.block_until_ready(out)
                self._use_buffered_weights = (mode == "buffered")
                return out[:B, :self._hidden_dim[-1]]
            except Exception as e:
                last_exc = e
                continue
        raise last_exc

    # -- tiled fallback -----------------------------------------------------
    def _get_tiled_packed(self):
        if self._tiled_packed is None:
            dims_t = [_round_up(d, _TILE) for d in self._hidden_dim]
            packed = []
            for i, (w, b) in enumerate(self.params):
                fan_out, fan_in = w.shape
                K, N = dims_t[i], dims_t[i + 1]
                wt = jnp.zeros((K, N), jnp.bfloat16)
                wt = wt.at[:fan_in, :fan_out].set(w.T.astype(jnp.bfloat16))
                bp = jnp.zeros((1, N), jnp.float32).at[0, :fan_out].set(b)
                packed.append((wt, bp))
            self._tiled_packed = packed
            self._tiled_dims = dims_t
        return self._tiled_packed

    def _forward_tiled(self, x):
        packed = self._get_tiled_packed()
        dims_t = self._tiled_dims
        B, IN = x.shape

        tm = _batch_tile(B)
        Mp = _round_up(max(B, _SUBLANE), tm)
        # Activations stay padded between layers: padded weight/bias columns
        # are exactly zero, so padded activation columns stay zero.
        h = jnp.zeros((Mp, dims_t[0]), jnp.bfloat16)
        h = h.at[:B, :IN].set(x.astype(jnp.bfloat16))

        for li, (wt, bp) in enumerate(packed):
            last = li == len(packed) - 1
            Kp, Np = wt.shape
            tk = 512 if (Kp % 512 == 0 and Kp >= 512) else _TILE
            tn = 512 if (Np % 512 == 0 and Np >= 512) else _TILE
            out_dtype = x.dtype if last else jnp.bfloat16
            h = _tiled_linear(h, wt, bp, tm=tm, tn=tn, tk=tk,
                              out_dtype=out_dtype,
                              vmem_limit=self._vmem_limit_bytes)
        return h[:B, :self._hidden_dim[-1]]

    # -- public forward -----------------------------------------------------
    def __call__(self, x):
        B, IN = x.shape
        assert IN == self._hidden_dim[0]
        if self._num_layers == 0:
            return x
        if self._fused_fits(B):
            try:
                return self._forward_fused(x)
            except Exception:
                pass  # fall through to the always-safe tiled path
        # TODO(synk): fp8 (v7x) / int8 (v5e,v6e) weight quantization path.
        return self._forward_tiled(x)


# ---------------------------------------------------------------------------
if __name__ == "__main__":
    key = jax.random.PRNGKey(0)
    hidden_dim = [32, 64, 16]           # hidden_dim list from __init__
    batch = 8

    key, kx, kp = jax.random.split(key, 3)
    x = jax.random.normal(kx, (batch, hidden_dim[0]), jnp.float32)

    mlp = MLP(hidden_dim, kp)
    y = mlp(x)
    y = jax.block_until_ready(y)

    # Cross-check against plain-JAX f32 reference of the same math.
    # (bf16 weight/activation cast => loosen tolerance vs the f32 reference.)
    ref = x
    for w, b in mlp.params:
        ref = ref @ w.T + b
    assert y.shape == (batch, hidden_dim[-1])
    assert jnp.allclose(y, ref, atol=5e-2, rtol=5e-2), \
        f"fused path mismatch: {jnp.max(jnp.abs(y - ref))}"

    # Also exercise the tiled fallback path (used for large hidden dims).
    y_t = jax.block_until_ready(mlp._forward_tiled(x))
    assert y_t.shape == (batch, hidden_dim[-1])
    assert jnp.allclose(y_t, ref, atol=5e-2, rtol=5e-2), \
        f"tiled path mismatch: {jnp.max(jnp.abs(y_t - ref))}"

    print("KERNEL_OK")
</pallas_src>

<mosaic_0001>
module attributes {stable_mosaic.version = 11 : i64} {
  func.func @kernel(%arg0: i32, %arg1: memref<8x128xf32, #tpu.memory_space<vmem>>, %arg2: memref<128x128xbf16, #tpu.memory_space<vmem>>, %arg3: memref<1x128xf32, #tpu.memory_space<vmem>>, %arg4: memref<128x128xbf16, #tpu.memory_space<vmem>>, %arg5: memref<1x128xf32, #tpu.memory_space<vmem>>, %arg6: memref<8x128xf32, #tpu.memory_space<vmem>>) attributes {dimension_semantics = [#tpu.dimension_semantics<parallel>], iteration_bounds = array<i64: 1>, scalar_prefetch = 0 : i64, scratch_operands = 0 : i64, tpu.core_type = #tpu.core_type<tc>, window_params = [{transform_indices = @transform_0, window_bounds = array<i64: 8, 128>}, {pipeline_mode = #tpu.pipeline_mode<synchronous>, transform_indices = @transform_1, window_bounds = array<i64: 128, 128>}, {pipeline_mode = #tpu.pipeline_mode<synchronous>, transform_indices = @transform_2, window_bounds = array<i64: 1, 128>}, {pipeline_mode = #tpu.pipeline_mode<synchronous>, transform_indices = @transform_3, window_bounds = array<i64: 128, 128>}, {pipeline_mode = #tpu.pipeline_mode<synchronous>, transform_indices = @transform_4, window_bounds = array<i64: 1, 128>}, {transform_indices = @transform_5, window_bounds = array<i64: 8, 128>}]} {
    %c0 = arith.constant 0 : index
    %c0_0 = arith.constant 0 : index
    %0 = vector.load %arg1[%c0, %c0_0] : memref<8x128xf32, #tpu.memory_space<vmem>>, vector<8x128xf32>
    %c0_1 = arith.constant 0 : index
    %c0_2 = arith.constant 0 : index
    %1 = vector.load %arg2[%c0_1, %c0_2] : memref<128x128xbf16, #tpu.memory_space<vmem>>, vector<128x128xbf16>
    %c0_3 = arith.constant 0 : index
    %c0_4 = arith.constant 0 : index
    %2 = vector.load %arg3[%c0_3, %c0_4] : memref<1x128xf32, #tpu.memory_space<vmem>>, vector<1x128xf32>
    %3 = arith.truncf %0 : vector<8x128xf32> to vector<8x128xbf16>
    %cst = arith.constant dense<0.000000e+00> : vector<8x128xf32>
    %4 = tpu.matmul %3, %1, %cst {dimension_numbers = #tpu.dot_dimension_numbers<[1], [0], [0], [1], [0, 0, 1, 1], [], []>} : vector<8x128xbf16>, vector<128x128xbf16>, vector<8x128xf32> -> vector<8x128xf32>
    %5 = vector.broadcast %2 : vector<1x128xf32> to vector<8x128xf32>
    %6 = arith.addf %4, %5 : vector<8x128xf32>
    %c0_5 = arith.constant 0 : index
    %c0_6 = arith.constant 0 : index
    %7 = vector.load %arg4[%c0_5, %c0_6] : memref<128x128xbf16, #tpu.memory_space<vmem>>, vector<128x128xbf16>
    %c0_7 = arith.constant 0 : index
    %c0_8 = arith.constant 0 : index
    %8 = vector.load %arg5[%c0_7, %c0_8] : memref<1x128xf32, #tpu.memory_space<vmem>>, vector<1x128xf32>
    %9 = arith.truncf %6 : vector<8x128xf32> to vector<8x128xbf16>
    %cst_9 = arith.constant dense<0.000000e+00> : vector<8x128xf32>
    %10 = tpu.matmul %9, %7, %cst_9 {dimension_numbers = #tpu.dot_dimension_numbers<[1], [0], [0], [1], [0, 0, 1, 1], [], []>} : vector<8x128xbf16>, vector<128x128xbf16>, vector<8x128xf32> -> vector<8x128xf32>
    %11 = vector.broadcast %8 : vector<1x128xf32> to vector<8x128xf32>
    %12 = arith.addf %10, %11 : vector<8x128xf32>
    %c0_10 = arith.constant 0 : index
    %c0_11 = arith.constant 0 : index
    %13 = vector.load %arg6[%c0_10, %c0_11] : memref<8x128xf32, #tpu.memory_space<vmem>>, vector<8x128xf32>
    tpu.vector_store %arg6[%c0_10, %c0_11], %12 {strides = array<i32>} : memref<8x128xf32, #tpu.memory_space<vmem>>, vector<8x128xf32>,
    return
  }
  func.func @transform_0(%arg0: i32) -> (i32, i32) {
    %c0_i32 = arith.constant 0 : i32
    %c0_i32_0 = arith.constant 0 : i32
    return %arg0, %c0_i32 : i32, i32
  }
  func.func @transform_1(%arg0: i32) -> (i32, i32) {
    %c0_i32 = arith.constant 0 : i32
    %c0_i32_0 = arith.constant 0 : i32
    %c0_i32_1 = arith.constant 0 : i32
    return %c0_i32, %c0_i32_0 : i32, i32
  }
  func.func @transform_2(%arg0: i32) -> (i32, i32) {
    %c0_i32 = arith.constant 0 : i32
    %c0_i32_0 = arith.constant 0 : i32
    %c0_i32_1 = arith.constant 0 : i32
    return %c0_i32, %c0_i32_0 : i32, i32
  }
  func.func @transform_3(%arg0: i32) -> (i32, i32) {
    %c0_i32 = arith.constant 0 : i32
    %c0_i32_0 = arith.constant 0 : i32
    %c0_i32_1 = arith.constant 0 : i32
    return %c0_i32, %c0_i32_0 : i32, i32
  }
  func.func @transform_4(%arg0: i32) -> (i32, i32) {
    %c0_i32 = arith.constant 0 : i32
    %c0_i32_0 = arith.constant 0 : i32
    %c0_i32_1 = arith.constant 0 : i32
    return %c0_i32, %c0_i32_0 : i32, i32
  }
  func.func @transform_5(%arg0: i32) -> (i32, i32) {
    %c0_i32 = arith.constant 0 : i32
    %c0_i32_0 = arith.constant 0 : i32
    return %arg0, %c0_i32 : i32, i32
  }
}

module attributes {stable_mosaic.version = 11 : i64} {
  func.func @kernel(%arg0: i32, %arg1: memref<8x128xf32, #tpu.memory_space<vmem>>, %arg2: memref<128x128xbf16, #tpu.memory_space<vmem>>, %arg3: memref<1x128xf32, #tpu.memory_space<vmem>>, %arg4: memref<128x128xbf16, #tpu.memory_space<vmem>>, %arg5: memref<1x128xf32, #tpu.memory_space<vmem>>, %arg6: memref<8x128xf32, #tpu.memory_space<vmem>>) attributes {dimension_semantics = [#tpu.dimension_semantics<parallel>], iteration_bounds = array<i64: 1>, scalar_prefetch = 0 : i64, scratch_operands = 0 : i64, tpu.core_type = #tpu.core_type<tc>, window_params = [{transform_indices = @transform_0, window_bounds = array<i64: 8, 128>}, {pipeline_mode = #tpu.pipeline_mode<synchronous>, transform_indices = @transform_1, window_bounds = array<i64: 128, 128>}, {pipeline_mode = #tpu.pipeline_mode<synchronous>, transform_indices = @transform_2, window_bounds = array<i64: 1, 128>}, {pipeline_mode = #tpu.pipeline_mode<synchronous>, transform_indices = @transform_3, window_bounds = array<i64: 128, 128>}, {pipeline_mode = #tpu.pipeline_mode<synchronous>, transform_indices = @transform_4, window_bounds = array<i64: 1, 128>}, {transform_indices = @transform_5, window_bounds = array<i64: 8, 128>}]} {
    %c0 = arith.constant 0 : index
    %c0_0 = arith.constant 0 : index
    %0 = vector.load %arg1[%c0, %c0_0] : memref<8x128xf32, #tpu.memory_space<vmem>>, vector<8x128xf32>
    %c0_1 = arith.constant 0 : index
    %c0_2 = arith.constant 0 : index
    %1 = vector.load %arg2[%c0_1, %c0_2] : memref<128x128xbf16, #tpu.memory_space<vmem>>, vector<128x128xbf16>
    %c0_3 = arith.constant 0 : index
    %c0_4 = arith.constant 0 : index
    %2 = vector.load %arg3[%c0_3, %c0_4] : memref<1x128xf32, #tpu.memory_space<vmem>>, vector<1x128xf32>
    %3 = arith.truncf %0 : vector<8x128xf32> to vector<8x128xbf16>
    %cst = arith.constant dense<0.000000e+00> : vector<8x128xf32>
    %4 = tpu.matmul %3, %1, %cst {dimension_numbers = #tpu.dot_dimension_numbers<[1], [0], [0], [1], [0, 0, 1, 1], [], []>} : vector<8x128xbf16>, vector<128x128xbf16>, vector<8x128xf32> -> vector<8x128xf32>
    %5 = vector.broadcast %2 : vector<1x128xf32> to vector<8x128xf32>
    %6 = arith.addf %4, %5 : vector<8x128xf32>
    %c0_5 = arith.constant 0 : index
    %c0_6 = arith.constant 0 : index
    %7 = vector.load %arg4[%c0_5, %c0_6] : memref<128x128xbf16, #tpu.memory_space<vmem>>, vector<128x128xbf16>
    %c0_7 = arith.constant 0 : index
    %c0_8 = arith.constant 0 : index
    %8 = vector.load %arg5[%c0_7, %c0_8] : memref<1x128xf32, #tpu.memory_space<vmem>>, vector<1x128xf32>
    %9 = arith.truncf %6 : vector<8x128xf32> to vector<8x128xbf16>
    %cst_9 = arith.constant dense<0.000000e+00> : vector<8x128xf32>
    %10 = tpu.matmul %9, %7, %cst_9 {dimension_numbers = #tpu.dot_dimension_numbers<[1], [0], [0], [1], [0, 0, 1, 1], [], []>} : vector<8x128xbf16>, vector<128x128xbf16>, vector<8x128xf32> -> vector<8x128xf32>
    %11 = vector.broadcast %8 : vector<1x128xf32> to vector<8x128xf32>
    %12 = arith.addf %10, %11 : vector<8x128xf32>
    %c0_10 = arith.constant 0 : index
    %c0_11 = arith.constant 0 : index
    %13 = vector.load %arg6[%c0_10, %c0_11] : memref<8x128xf32, #tpu.memory_space<vmem>>, vector<8x128xf32>
    tpu.vector_store %arg6[%c0_10, %c0_11], %12 {strides = array<i32>} : memref<8x128xf32, #tpu.memory_space<vmem>>, vector<8x128xf32>,
    return
  }
  func.func @transform_0(%arg0: i32) -> (i32, i32) {
    %c0_i32 = arith.constant 0 : i32
    %c0_i32_0 = arith.constant 0 : i32
    return %arg0, %c0_i32 : i32, i32
  }
  func.func @transform_1(%arg0: i32) -> (i32, i32) {
    %c0_i32 = arith.constant 0 : i32
    %c0_i32_0 = arith.constant 0 : i32
    %c0_i32_1 = arith.constant 0 : i32
    return %c0_i32, %c0_i32_0 : i32, i32
  }
  func.func @transform_2(%arg0: i32) -> (i32, i32) {
    %c0_i32 = arith.constant 0 : i32
    %c0_i32_0 = arith.constant 0 : i32
    %c0_i32_1 = arith.constant 0 : i32
    return %c0_i32, %c0_i32_0 : i32, i32
  }
  func.func @transform_3(%arg0: i32) -> (i32, i32) {
    %c0_i32 = arith.constant 0 : i32
    %c0_i32_0 = arith.constant 0 : i32
    %c0_i32_1 = arith.constant 0 : i32
    return %c0_i32, %c0_i32_0 : i32, i32
  }
  func.func @transform_4(%arg0: i32) -> (i32, i32) {
    %c0_i32 = arith.constant 0 : i32
    %c0_i32_0 = arith.constant 0 : i32
    %c0_i32_1 = arith.constant 0 : i32
    return %c0_i32, %c0_i32_0 : i32, i32
  }
  func.func @transform_5(%arg0: i32) -> (i32, i32) {
    %c0_i32 = arith.constant 0 : i32
    %c0_i32_0 = arith.constant 0 : i32
    return %arg0, %c0_i32 : i32, i32
  }
}

module attributes {stable_mosaic.version = 11 : i64} {
  func.func @_tiled_linear_kernel(%arg0: i32, %arg1: i32, %arg2: i32, %arg3: memref<8x256xbf16, #tpu.memory_space<vmem>>, %arg4: memref<256x256xbf16, #tpu.memory_space<vmem>>, %arg5: memref<1x256xf32, #tpu.memory_space<vmem>>, %arg6: memref<8x256xbf16, #tpu.memory_space<vmem>>, %arg7: memref<8x256xf32, #tpu.memory_space<vmem>>) attributes {dimension_semantics = [#tpu.dimension_semantics<parallel>, #tpu.dimension_semantics<parallel>, #tpu.dimension_semantics<arbitrary>], iteration_bounds = array<i64: 1, 1, 1>, scalar_prefetch = 0 : i64, scratch_operands = 1 : i64, tpu.core_type = #tpu.core_type<tc>, window_params = [{transform_indices = @transform_0, window_bounds = array<i64: 8, 256>}, {transform_indices = @transform_1, window_bounds = array<i64: 256, 256>}, {transform_indices = @transform_2, window_bounds = array<i64: 1, 256>}, {transform_indices = @transform_3, window_bounds = array<i64: 8, 256>}]} {
    %c0_i32 = arith.constant 0 : i32
    %0 = arith.cmpi eq, %arg2, %c0_i32 : i32
    %1 = arith.extui %0 : i1 to i32
    %c0_i32_0 = arith.constant 0 : i32
    %2 = arith.cmpi ne, %1, %c0_i32_0 : i32
    scf.if %2 {
      %cst_10 = arith.constant 0.000000e+00 : f32
      %12 = vector.broadcast %cst_10 : f32 to vector<8x256xf32>
      %c0_11 = arith.constant 0 : index
      %c0_12 = arith.constant 0 : index
      %13 = vector.load %arg7[%c0_11, %c0_12] : memref<8x256xf32, #tpu.memory_space<vmem>>, vector<8x256xf32>
      tpu.vector_store %arg7[%c0_11, %c0_12], %12 {strides = array<i32>} : memref<8x256xf32, #tpu.memory_space<vmem>>, vector<8x256xf32>,
    } else {
    }
    %c0 = arith.constant 0 : index
    %c0_1 = arith.constant 0 : index
    %3 = vector.load %arg7[%c0, %c0_1] : memref<8x256xf32, #tpu.memory_space<vmem>>, vector<8x256xf32>
    %c0_2 = arith.constant 0 : index
    %c0_3 = arith.constant 0 : index
    %4 = vector.load %arg3[%c0_2, %c0_3] : memref<8x256xbf16, #tpu.memory_space<vmem>>, vector<8x256xbf16>
    %c0_4 = arith.constant 0 : index
    %c0_5 = arith.constant 0 : index
    %5 = vector.load %arg4[%c0_4, %c0_5] : memref<256x256xbf16, #tpu.memory_space<vmem>>, vector<256x256xbf16>
    %cst = arith.constant dense<0.000000e+00> : vector<8x256xf32>
    %6 = tpu.matmul %4, %5, %cst {dimension_numbers = #tpu.dot_dimension_numbers<[1], [0], [0], [1], [0, 0, 1, 1], [], []>} : vector<8x256xbf16>, vector<256x256xbf16>, vector<8x256xf32> -> vector<8x256xf32>
    %7 = arith.addf %3, %6 : vector<8x256xf32>
    %c0_6 = arith.constant 0 : index
    %c0_7 = arith.constant 0 : index
    %8 = vector.load %arg7[%c0_6, %c0_7] : memref<8x256xf32, #tpu.memory_space<vmem>>, vector<8x256xf32>
    tpu.vector_store %arg7[%c0_6, %c0_7], %7 {strides = array<i32>} : memref<8x256xf32, #tpu.memory_space<vmem>>, vector<8x256xf32>,
    %c0_i32_8 = arith.constant 0 : i32
    %9 = arith.cmpi eq, %arg2, %c0_i32_8 : i32
    %10 = arith.extui %9 : i1 to i32
    %c0_i32_9 = arith.constant 0 : i32
    %11 = arith.cmpi ne, %10, %c0_i32_9 : i32
    scf.if %11 {
      %c0_10 = arith.constant 0 : index
      %c0_11 = arith.constant 0 : index
      %12 = vector.load %arg7[%c0_10, %c0_11] : memref<8x256xf32, #tpu.memory_space<vmem>>, vector<8x256xf32>
      %c0_12 = arith.constant 0 : index
      %c0_13 = arith.constant 0 : index
      %13 = vector.load %arg5[%c0_12, %c0_13] : memref<1x256xf32, #tpu.memory_space<vmem>>, vector<1x256xf32>
      %14 = vector.broadcast %13 : vector<1x256xf32> to vector<8x256xf32>
      %15 = arith.addf %12, %14 : vector<8x256xf32>
      %16 = arith.truncf %15 : vector<8x256xf32> to vector<8x256xbf16>
      %c0_14 = arith.constant 0 : index
      %c0_15 = arith.constant 0 : index
      %17 = vector.load %arg6[%c0_14, %c0_15] : memref<8x256xbf16, #tpu.memory_space<vmem>>, vector<8x256xbf16>
      tpu.vector_store %arg6[%c0_14, %c0_15], %16 {strides = array<i32>} : memref<8x256xbf16, #tpu.memory_space<vmem>>, vector<8x256xbf16>,
    } else {
    }
    return
  }
  func.func @transform_0(%arg0: i32, %arg1: i32, %arg2: i32) -> (i32, i32) {
    %c0_i32 = arith.constant 0 : i32
    return %arg0, %arg2 : i32, i32
  }
  func.func @transform_1(%arg0: i32, %arg1: i32, %arg2: i32) -> (i32, i32) {
    %c0_i32 = arith.constant 0 : i32
    return %arg2, %arg1 : i32, i32
  }
  func.func @transform_2(%arg0: i32, %arg1: i32, %arg2: i32) -> (i32, i32) {
    %c0_i32 = arith.constant 0 : i32
    %c0_i32_0 = arith.constant 0 : i32
    return %c0_i32, %arg1 : i32, i32
  }
  func.func @transform_3(%arg0: i32, %arg1: i32, %arg2: i32) -> (i32, i32) {
    %c0_i32 = arith.constant 0 : i32
    return %arg0, %arg1 : i32, i32
  }
}

</mosaic_0001>

<bundles_post_ra>
// kernel: tpu_custom_call.1
= control target key start
LH: loop header
LB: loop body
LE: loop exit
PB: predicated region body
PF: predicated region fallthrough
CT: control target
= control target key end

     0   :  { %10 = vsyncpa [#allocation3], 0  ;;  %s595_s0 = inlined_call_operand.hbm [shape: f32[8,128], index: 0, kind: input, shape index: {}]   ;;  %s596_s1 = inlined_call_operand.hbm [shape: bf16[128,128], index: 1, kind: input, shape index: {}]   ;;  %s597_s2 = inlined_call_operand.vmem [shape: f32[1,128], index: 2, kind: input, shape index: {}]   ;;  %s598_s3 = inlined_call_operand.hbm [shape: bf16[128,128], index: 3, kind: input, shape index: {}]   ;;  %s599_s4 = inlined_call_operand.vmem [shape: f32[1,128], index: 4, kind: input, shape index: {}]   ;;  %s600_s5 = inlined_call_operand.hbm [shape: f32[8,128], index: 5, kind: output, shape index: {}]  }
   0x1   :  { %11 = vsyncpa [#allocation6], 0 }
   0x2   :  { %12 = vsyncpa [#allocation4], 0  ;;  %s497_s18 = smov [#allocation5]   ;;  %s403_s22 = scalar_lea.hbm %s596_s1, 1024 }
   0x3   :  { %s28_s19 = sshll.u32 %s497_s18, 4  ;;  %p404_p0 = scmp.ne.s32.totalorder %s596_s1, %s403_s22  ;;  %s29_s19 = int_to_ptr.vmem [resolvable:$true] %s28_s19 }
   0x4   :  { %p407_p1 = scmp.lt.u32.totalorder %s403_s22, %s596_s1 }
   0x6   :  { %p409_p2 = pnand %p407_p1, %p404_p0 }
   0x8   :  { %412 = shalt.err (!%p409_p2)
}
   0x9   :  { %s413_s27 = scalar_lea.vmem %s29_s19, 1024  ;;  %p418_p4 = scmp.lt.s32.totalorder %s29_s19, %s29_s19 }
   0xa   :  { %p414_p3 = scmp.ne.s32.totalorder %s29_s19, %s413_s27  ;;  %p419_p5 = scmp.lt.s32.totalorder %s413_s27, %s413_s27 }
   0xc   :  { %p420_p6 = por %p419_p5, %p418_p4 }
   0xe   :  { %p421_p7 = pnand %p420_p6, %p414_p3 }
  0x10   :  { %424 = shalt.err (!%p421_p7)
}
  0x11   :  { %s498_s28 = smov 64   ;;  %s499_s29 = smov 4  }
  0x12   :  { %34 = dma.hbm_to_vmem [thread:$0]  %s596_s1, 1024, %s29_s19, [#allocation6], %s498_s28, %s498_s28, %s499_s29  }
  0x13   :  { %s500_s7 = smov [#allocation2]   ;;  %s501_s9 = smov [#allocation7]  }
  0x14   :  { %s19_s8 = sshll.u32 %s500_s7, 4  ;;  %s42_s10 = sshll.u32 %s501_s9, 4  ;;  %s20_s8 = int_to_ptr.vmem [resolvable:$true] %s19_s8  ;;  %s43_s10 = int_to_ptr.vmem [resolvable:$true] %s42_s10 }
  0x15   :  { %s425_s13 = scalar_lea.hbm %s595_s0, 128 }
  0x16   :  { %p426_p8 = scmp.ne.s32.totalorder %s595_s0, %s425_s13  ;;  %p429_p9 = scmp.lt.u32.totalorder %s425_s13, %s595_s0 }
  0x18   :  { %p431_p10 = pnand %p429_p9, %p426_p8 }
  0x1a   :  { %434 = shalt.err (!%p431_p10)
}
  0x1b   :  { %s435_s1 = scalar_lea.vmem %s20_s8, 128  ;;  %p440_p12 = scmp.lt.s32.totalorder %s20_s8, %s20_s8 }
  0x1c   :  { %p436_p11 = scmp.ne.s32.totalorder %s20_s8, %s435_s1  ;;  %p441_p13 = scmp.lt.s32.totalorder %s435_s1, %s435_s1 }
  0x1e   :  { %p442_p0 = por %p441_p13, %p440_p12 }
  0x20   :  { %p443_p1 = pnand %p442_p0, %p436_p11 }
  0x22   :  { %446 = shalt.err (!%p443_p1)
}
  0x23   :  { %22 = dma.hbm_to_vmem [thread:$0]  %s595_s0, 128, %s20_s8, [#allocation3]  }
  0x24   :  { %s447_s22 = scalar_lea.hbm %s598_s3, 1024 }
  0x25   :  { %p448_p2 = scmp.ne.s32.totalorder %s598_s3, %s447_s22  ;;  %p451_p3 = scmp.lt.u32.totalorder %s447_s22, %s598_s3 }
  0x27   :  { %p453_p4 = pnand %p451_p3, %p448_p2 }
  0x29   :  { %456 = shalt.err (!%p453_p4)
}
  0x2a   :  { %s457_s27 = scalar_lea.vmem %s43_s10, 1024  ;;  %p462_p6 = scmp.lt.s32.totalorder %s43_s10, %s43_s10 }
  0x2b   :  { %p458_p5 = scmp.ne.s32.totalorder %s43_s10, %s457_s27  ;;  %p463_p7 = scmp.lt.s32.totalorder %s457_s27, %s457_s27 }
  0x2d   :  { %p464_p8 = por %p463_p7, %p462_p6 }
  0x2f   :  { %p465_p9 = pnand %p464_p8, %p458_p5 }
  0x31   :  { %468 = shalt.err (!%p465_p9)
}
  0x32   :  { %48 = dma.hbm_to_vmem [thread:$0]  %s598_s3, 1024, %s43_s10, [#allocation6], %s498_s28, %s498_s28, %s499_s29  }
  0x33   :  { %491 = dma.done.wait [#allocation3], 128  }
  0x34   :  { %492 = vsyncadd [#allocation3], 4294967168 }
  0x35   :  { %493 = dma.done.wait [#allocation6], 2048  }
  0x36   :  { %494 = vsyncadd [#allocation6], 4294965248  ;;  %v502_v0 = vmov 0.0   ;;  %vm503_vm0 = vmmov 0   ;;  %v387_v1 = vld [vmem:[#allocation5] sm:$0xff]   ;;  %v388_v2 = vld [vmem:[#allocation5 + $0x8] sm:$0xff]  }
  0x37   :  { %339 = vmatprep.subr.bf16.mxu0 %v502_v0  ;;  %355 = vmatprep.mubr.msk.bf16.mxu0 %vm503_vm0, %v502_v0  ;;  %v389_v3 = vld [vmem:[#allocation5 + $0x10] sm:$0xff]   ;;  %v395_v4 = vld [vmem:[#allocation7] sm:$0xff]   ;;  %v390_v5 = vld [vmem:[#allocation5 + $0x18] sm:$0xff]   ;;  %s504_s7 = smov [#allocation8]  }
  0x38   :  { %359 = vmatprep.subr.bf16.mxu1 %v502_v0  ;;  %375 = vmatprep.mubr.msk.bf16.mxu1 %vm503_vm0, %v502_v0  ;;  %v396_v6 = vld [vmem:[#allocation7 + $0x8] sm:$0xff]   ;;  %v391_v7 = vld [vmem:[#allocation5 + $0x20] sm:$0xff]   ;;  %v397_v8 = vld [vmem:[#allocation7 + $0x10] sm:$0xff]   ;;  %s293_s8 = sshll.u32 %s504_s7, 4  ;;  %s294_s8 = int_to_ptr.vmem [resolvable:$true] %s293_s8 }
  0x39   :  { %340 = vmatpush3.bf16.msra.mxu0 %v387_v1  ;;  %360 = vmatpush3.bf16.msra.mxu1 %v395_v4  ;;  %v392_v9 = vld [vmem:[#allocation5 + $0x28] sm:$0xff]   ;;  %v398_v10 = vld [vmem:[#allocation7 + $0x18] sm:$0xff]   ;;  %v393_v11 = vld [vmem:[#allocation5 + $0x30] sm:$0xff]   ;;  %p474_p11 = scmp.lt.s32.totalorder %s294_s8, %s294_s8 }
  0x3a   :  { %341 = vmatprep.subr.bf16.mxu0 %v502_v0  ;;  %361 = vmatprep.subr.bf16.mxu1 %v502_v0  ;;  %v399_v12 = vld [vmem:[#allocation7 + $0x20] sm:$0xff]   ;;  %v394_v13 = vld [vmem:[#allocation5 + $0x38] sm:$0xff]   ;;  %v400_v15 = vld [vmem:[#allocation7 + $0x28] sm:$0xff]  }
  0x3b   :  { %v61_v14 = vld [vmem:[#allocation2] sm:$0xff]  ;;  %v401_v17 = vld [vmem:[#allocation7 + $0x30] sm:$0xff]  }
  0x3c   :  { %v79_v16 = vpack.c.bf16 %v61_v14, %v61_v14  ;;  %v402_v18 = vld [vmem:[#allocation7 + $0x38] sm:$0xff]  }
  0x3d   :  { %342 = vmatpush3.bf16.msra.mxu0 %v388_v2  ;;  %362 = vmatpush3.bf16.msra.mxu1 %v396_v6  ;;  %v303_v19 = vld [vmem:[%s597_s2] ss:$0 sm:$0xff]  ;;  %s469_s2 = scalar_lea.vmem %s294_s8, 128 }
  0x3e   :  { %343 = vmatprep.subr.bf16.mxu0 %v502_v0  ;;  %363 = vmatprep.subr.bf16.mxu1 %v502_v0  ;;  %v312_v26 = vld [vmem:[%s599_s4] ss:$0 sm:$0xff]  ;;  %p470_p10 = scmp.ne.s32.totalorder %s294_s8, %s469_s2  ;;  %p475_p12 = scmp.lt.s32.totalorder %s469_s2, %s469_s2 }
  0x40   :  { %p476_p13 = por %p475_p12, %p474_p11 }
  0x41   :  { %344 = vmatpush3.bf16.msra.mxu0 %v389_v3  ;;  %364 = vmatpush3.bf16.msra.mxu1 %v397_v8 }
  0x42   :  { %345 = vmatprep.subr.bf16.mxu0 %v502_v0  ;;  %365 = vmatprep.subr.bf16.mxu1 %v502_v0  ;;  %p477_p0 = pnand %p476_p13, %p470_p10 }
  0x45   :  { %346 = vmatpush3.bf16.msra.mxu0 %v390_v5  ;;  %366 = vmatpush3.bf16.msra.mxu1 %v398_v10 }
  0x46   :  { %347 = vmatprep.subr.bf16.mxu0 %v502_v0  ;;  %367 = vmatprep.subr.bf16.mxu1 %v502_v0 }
  0x49   :  { %348 = vmatpush3.bf16.msra.mxu0 %v391_v7  ;;  %368 = vmatpush3.bf16.msra.mxu1 %v399_v12 }
  0x4a   :  { %349 = vmatprep.subr.bf16.mxu0 %v502_v0  ;;  %369 = vmatprep.subr.bf16.mxu1 %v502_v0 }
  0x4d   :  { %350 = vmatpush3.bf16.msra.mxu0 %v392_v9  ;;  %370 = vmatpush3.bf16.msra.mxu1 %v400_v15 }
  0x4e   :  { %351 = vmatprep.subr.bf16.mxu0 %v502_v0  ;;  %371 = vmatprep.subr.bf16.mxu1 %v502_v0 }
  0x51   :  { %352 = vmatpush3.bf16.msra.mxu0 %v393_v11  ;;  %372 = vmatpush3.bf16.msra.mxu1 %v401_v17 }
  0x52   :  { %353 = vmatprep.subr.bf16.mxu0 %v502_v0  ;;  %373 = vmatprep.subr.bf16.mxu1 %v502_v0 }
  0x55   :  { %354 = vmatpush3.bf16.msra.mxu0 %v394_v13  ;;  %374 = vmatpush3.bf16.msra.mxu1 %v402_v18 }
  0x58   :  { %356 = vmatmul.mubr.bf16.vlgmr.msra.gmra.mrb[0].mxu0 %v79_v16 }
 0x12b   :  { %v168_v20 = vpop.f32.mrb[0].mxu0 }
 0x12c   :  { %v169_v21 = vadd.f32 %v303_v19, %v168_v20  ;;  %v357_v22 = vpop.f32.mrb[1].mxu0 }
 0x12d   :  { %v171_v23 = vpop.f32.mrb[2].mxu0 }
 0x12e   :  { %v191_v24 = vpack.c.bf16 %v169_v21, %v169_v21  ;;  %v358_v25 = vpop.f32.mrb[3].mxu0 }
 0x130   :  { %376 = vmatmul.mubr.bf16.vlgmr.msra.gmra.mrb[0].mxu1 %v191_v24 }
 0x203   :  { %v280_v27 = vpop.f32.mrb[0].mxu1 }
 0x204   :  { %v281_v28 = vadd.f32 %v312_v26, %v280_v27  ;;  %v377_v29 = vpop.f32.mrb[1].mxu1 }
 0x205   :  { %v283_v30 = vpop.f32.mrb[2].mxu1 }
 0x206   :  { %286 = vst [vmem:[#allocation8] sm:$0xff] %v281_v28  ;;  %v378_v31 = vpop.f32.mrb[3].mxu1 }
 0x207   :  { %480 = shalt.err (!%p477_p0)
}
 0x208   :  { %s481_s4 = scalar_lea.hbm %s600_s5, 128 }
 0x209   :  { %p482_p1 = scmp.ne.s32.totalorder %s600_s5, %s481_s4  ;;  %p485_p2 = scmp.lt.u32.totalorder %s481_s4, %s600_s5 }
 0x20b   :  { %p487_p3 = pnand %p485_p2, %p482_p1 }
 0x20d   :  { %490 = shalt.err (!%p487_p3)
}
 0x20e   :  { %296 = dma.vmem_to_hbm [thread:$0]  %s294_s8, 128, %s600_s5, [#allocation4]  }
 0x20f   :  { %495 = dma.done.wait [#allocation4], 128  }
 0x210   :  { %496 = vsyncadd [#allocation4], 4294967168 }
 0x211   :  { %300 = vsyncpa [#allocation3], 1 }
 0x212   :  { %301 = vsyncpa [#allocation6], 1 }
 0x213   :  { %302 = vsyncpa [#allocation4], 1 }

// kernel: tpu_custom_call.1
= control target key start
LH: loop header
LB: loop body
LE: loop exit
PB: predicated region body
PF: predicated region fallthrough
CT: control target
= control target key end

     0   :  { %10 = vsyncpa [#allocation3], 0  ;;  %s595_s0 = inlined_call_operand.hbm [shape: f32[8,128], index: 0, kind: input, shape index: {}]   ;;  %s596_s1 = inlined_call_operand.hbm [shape: bf16[128,128], index: 1, kind: input, shape index: {}]   ;;  %s597_s2 = inlined_call_operand.vmem [shape: f32[1,128], index: 2, kind: input, shape index: {}]   ;;  %s598_s3 = inlined_call_operand.hbm [shape: bf16[128,128], index: 3, kind: input, shape index: {}]   ;;  %s599_s4 = inlined_call_operand.vmem [shape: f32[1,128], index: 4, kind: input, shape index: {}]   ;;  %s600_s5 = inlined_call_operand.hbm [shape: f32[8,128], index: 5, kind: output, shape index: {}]  }
   0x1   :  { %11 = vsyncpa [#allocation6], 0 }
   0x2   :  { %12 = vsyncpa [#allocation4], 0  ;;  %s497_s18 = smov [#allocation5]   ;;  %s403_s22 = scalar_lea.hbm %s596_s1, 1024 }
   0x3   :  { %s28_s19 = sshll.u32 %s497_s18, 4  ;;  %p404_p0 = scmp.ne.s32.totalorder %s596_s1, %s403_s22  ;;  %s29_s19 = int_to_ptr.vmem [resolvable:$true] %s28_s19 }
   0x4   :  { %p407_p1 = scmp.lt.u32.totalorder %s403_s22, %s596_s1 }
   0x6   :  { %p409_p2 = pnand %p407_p1, %p404_p0 }
   0x8   :  { %412 = shalt.err (!%p409_p2)
}
   0x9   :  { %s413_s27 = scalar_lea.vmem %s29_s19, 1024  ;;  %p418_p4 = scmp.lt.s32.totalorder %s29_s19, %s29_s19 }
   0xa   :  { %p414_p3 = scmp.ne.s32.totalorder %s29_s19, %s413_s27  ;;  %p419_p5 = scmp.lt.s32.totalorder %s413_s27, %s413_s27 }
   0xc   :  { %p420_p6 = por %p419_p5, %p418_p4 }
   0xe   :  { %p421_p7 = pnand %p420_p6, %p414_p3 }
  0x10   :  { %424 = shalt.err (!%p421_p7)
}
  0x11   :  { %s498_s28 = smov 64   ;;  %s499_s29 = smov 4  }
  0x12   :  { %34 = dma.hbm_to_vmem [thread:$0]  %s596_s1, 1024, %s29_s19, [#allocation6], %s498_s28, %s498_s28, %s499_s29  }
  0x13   :  { %s500_s7 = smov [#allocation2]   ;;  %s501_s9 = smov [#allocation7]  }
  0x14   :  { %s19_s8 = sshll.u32 %s500_s7, 4  ;;  %s42_s10 = sshll.u32 %s501_s9, 4  ;;  %s20_s8 = int_to_ptr.vmem [resolvable:$true] %s19_s8  ;;  %s43_s10 = int_to_ptr.vmem [resolvable:$true] %s42_s10 }
  0x15   :  { %s425_s13 = scalar_lea.hbm %s595_s0, 128 }
  0x16   :  { %p426_p8 = scmp.ne.s32.totalorder %s595_s0, %s425_s13  ;;  %p429_p9 = scmp.lt.u32.totalorder %s425_s13, %s595_s0 }
  0x18   :  { %p431_p10 = pnand %p429_p9, %p426_p8 }
  0x1a   :  { %434 = shalt.err (!%p431_p10)
}
  0x1b   :  { %s435_s1 = scalar_lea.vmem %s20_s8, 128  ;;  %p440_p12 = scmp.lt.s32.totalorder %s20_s8, %s20_s8 }
  0x1c   :  { %p436_p11 = scmp.ne.s32.totalorder %s20_s8, %s435_s1  ;;  %p441_p13 = scmp.lt.s32.totalorder %s435_s1, %s435_s1 }
  0x1e   :  { %p442_p0 = por %p441_p13, %p440_p12 }
  0x20   :  { %p443_p1 = pnand %p442_p0, %p436_p11 }
  0x22   :  { %446 = shalt.err (!%p443_p1)
}
  0x23   :  { %22 = dma.hbm_to_vmem [thread:$0]  %s595_s0, 128, %s20_s8, [#allocation3]  }
  0x24   :  { %s447_s22 = scalar_lea.hbm %s598_s3, 1024 }
  0x25   :  { %p448_p2 = scmp.ne.s32.totalorder %s598_s3, %s447_s22  ;;  %p451_p3 = scmp.lt.u32.totalorder %s447_s22, %s598_s3 }
  0x27   :  { %p453_p4 = pnand %p451_p3, %p448_p2 }
  0x29   :  { %456 = shalt.err (!%p453_p4)
}
  0x2a   :  { %s457_s27 = scalar_lea.vmem %s43_s10, 1024  ;;  %p462_p6 = scmp.lt.s32.totalorder %s43_s10, %s43_s10 }
  0x2b   :  { %p458_p5 = scmp.ne.s32.totalorder %s43_s10, %s457_s27  ;;  %p463_p7 = scmp.lt.s32.totalorder %s457_s27, %s457_s27 }
  0x2d   :  { %p464_p8 = por %p463_p7, %p462_p6 }
  0x2f   :  { %p465_p9 = pnand %p464_p8, %p458_p5 }
  0x31   :  { %468 = shalt.err (!%p465_p9)
}
  0x32   :  { %48 = dma.hbm_to_vmem [thread:$0]  %s598_s3, 1024, %s43_s10, [#allocation6], %s498_s28, %s498_s28, %s499_s29  }
  0x33   :  { %491 = dma.done.wait [#allocation3], 128  }
  0x34   :  { %492 = vsyncadd [#allocation3], 4294967168 }
  0x35   :  { %493 = dma.done.wait [#allocation6], 2048  }
  0x36   :  { %494 = vsyncadd [#allocation6], 4294965248  ;;  %v502_v0 = vmov 0.0   ;;  %vm503_vm0 = vmmov 0   ;;  %v387_v1 = vld [vmem:[#allocation5] sm:$0xff]   ;;  %v388_v2 = vld [vmem:[#allocation5 + $0x8] sm:$0xff]  }
  0x37   :  { %339 = vmatprep.subr.bf16.mxu0 %v502_v0  ;;  %355 = vmatprep.mubr.msk.bf16.mxu0 %vm503_vm0, %v502_v0  ;;  %v389_v3 = vld [vmem:[#allocation5 + $0x10] sm:$0xff]   ;;  %v395_v4 = vld [vmem:[#allocation7] sm:$0xff]   ;;  %v390_v5 = vld [vmem:[#allocation5 + $0x18] sm:$0xff]   ;;  %s504_s7 = smov [#allocation8]  }
  0x38   :  { %359 = vmatprep.subr.bf16.mxu1 %v502_v0  ;;  %375 = vmatprep.mubr.msk.bf16.mxu1 %vm503_vm0, %v502_v0  ;;  %v396_v6 = vld [vmem:[#allocation7 + $0x8] sm:$0xff]   ;;  %v391_v7 = vld [vmem:[#allocation5 + $0x20] sm:$0xff]   ;;  %v397_v8 = vld [vmem:[#allocation7 + $0x10] sm:$0xff]   ;;  %s293_s8 = sshll.u32 %s504_s7, 4  ;;  %s294_s8 = int_to_ptr.vmem [resolvable:$true] %s293_s8 }
  0x39   :  { %340 = vmatpush3.bf16.msra.mxu0 %v387_v1  ;;  %360 = vmatpush3.bf16.msra.mxu1 %v395_v4  ;;  %v392_v9 = vld [vmem:[#allocation5 + $0x28] sm:$0xff]   ;;  %v398_v10 = vld [vmem:[#allocation7 + $0x18] sm:$0xff]   ;;  %v393_v11 = vld [vmem:[#allocation5 + $0x30] sm:$0xff]   ;;  %p474_p11 = scmp.lt.s32.totalorder %s294_s8, %s294_s8 }
  0x3a   :  { %341 = vmatprep.subr.bf16.mxu0 %v502_v0  ;;  %361 = vmatprep.subr.bf16.mxu1 %v502_v0  ;;  %v399_v12 = vld [vmem:[#allocation7 + $0x20] sm:$0xff]   ;;  %v394_v13 = vld [vmem:[#allocation5 + $0x38] sm:$0xff]   ;;  %v400_v15 = vld [vmem:[#allocation7 + $0x28] sm:$0xff]  }
  0x3b   :  { %v61_v14 = vld [vmem:[#allocation2] sm:$0xff]  ;;  %v401_v17 = vld [vmem:[#allocation7 + $0x30] sm:$0xff]  }
  0x3c   :  { %v79_v16 = vpack.c.bf16 %v61_v14, %v61_v14  ;;  %v402_v18 = vld [vmem:[#allocation7 + $0x38] sm:$0xff]  }
  0x3d   :  { %342 = vmatpush3.bf16.msra.mxu0 %v388_v2  ;;  %362 = vmatpush3.bf16.msra.mxu1 %v396_v6  ;;  %v303_v19 = vld [vmem:[%s597_s2] ss:$0 sm:$0xff]  ;;  %s469_s2 = scalar_lea.vmem %s294_s8, 128 }
  0x3e   :  { %343 = vmatprep.subr.bf16.mxu0 %v502_v0  ;;  %363 = vmatprep.subr.bf16.mxu1 %v502_v0  ;;  %v312_v26 = vld [vmem:[%s599_s4] ss:$0 sm:$0xff]  ;;  %p470_p10 = scmp.ne.s32.totalorder %s294_s8, %s469_s2  ;;  %p475_p12 = scmp.lt.s32.totalorder %s469_s2, %s469_s2 }
  0x40   :  { %p476_p13 = por %p475_p12, %p474_p11 }
  0x41   :  { %344 = vmatpush3.bf16.msra.mxu0 %v389_v3  ;;  %364 = vmatpush3.bf16.msra.mxu1 %v397_v8 }
  0x42   :  { %345 = vmatprep.subr.bf16.mxu0 %v502_v0  ;;  %365 = vmatprep.subr.bf16.mxu1 %v502_v0  ;;  %p477_p0 = pnand %p476_p13, %p470_p10 }
  0x45   :  { %346 = vmatpush3.bf16.msra.mxu0 %v390_v5  ;;  %366 = vmatpush3.bf16.msra.mxu1 %v398_v10 }
  0x46   :  { %347 = vmatprep.subr.bf16.mxu0 %v502_v0  ;;  %367 = vmatprep.subr.bf16.mxu1 %v502_v0 }
  0x49   :  { %348 = vmatpush3.bf16.msra.mxu0 %v391_v7  ;;  %368 = vmatpush3.bf16.msra.mxu1 %v399_v12 }
  0x4a   :  { %349 = vmatprep.subr.bf16.mxu0 %v502_v0  ;;  %369 = vmatprep.subr.bf16.mxu1 %v502_v0 }
  0x4d   :  { %350 = vmatpush3.bf16.msra.mxu0 %v392_v9  ;;  %370 = vmatpush3.bf16.msra.mxu1 %v400_v15 }
  0x4e   :  { %351 = vmatprep.subr.bf16.mxu0 %v502_v0  ;;  %371 = vmatprep.subr.bf16.mxu1 %v502_v0 }
  0x51   :  { %352 = vmatpush3.bf16.msra.mxu0 %v393_v11  ;;  %372 = vmatpush3.bf16.msra.mxu1 %v401_v17 }
  0x52   :  { %353 = vmatprep.subr.bf16.mxu0 %v502_v0  ;;  %373 = vmatprep.subr.bf16.mxu1 %v502_v0 }
  0x55   :  { %354 = vmatpush3.bf16.msra.mxu0 %v394_v13  ;;  %374 = vmatpush3.bf16.msra.mxu1 %v402_v18 }
  0x58   :  { %356 = vmatmul.mubr.bf16.vlgmr.msra.gmra.mrb[0].mxu0 %v79_v16 }
 0x12b   :  { %v168_v20 = vpop.f32.mrb[0].mxu0 }
 0x12c   :  { %v169_v21 = vadd.f32 %v303_v19, %v168_v20  ;;  %v357_v22 = vpop.f32.mrb[1].mxu0 }
 0x12d   :  { %v171_v23 = vpop.f32.mrb[2].mxu0 }
 0x12e   :  { %v191_v24 = vpack.c.bf16 %v169_v21, %v169_v21  ;;  %v358_v25 = vpop.f32.mrb[3].mxu0 }
 0x130   :  { %376 = vmatmul.mubr.bf16.vlgmr.msra.gmra.mrb[0].mxu1 %v191_v24 }
 0x203   :  { %v280_v27 = vpop.f32.mrb[0].mxu1 }
 0x204   :  { %v281_v28 = vadd.f32 %v312_v26, %v280_v27  ;;  %v377_v29 = vpop.f32.mrb[1].mxu1 }
 0x205   :  { %v283_v30 = vpop.f32.mrb[2].mxu1 }
 0x206   :  { %286 = vst [vmem:[#allocation8] sm:$0xff] %v281_v28  ;;  %v378_v31 = vpop.f32.mrb[3].mxu1 }
 0x207   :  { %480 = shalt.err (!%p477_p0)
}
 0x208   :  { %s481_s4 = scalar_lea.hbm %s600_s5, 128 }
 0x209   :  { %p482_p1 = scmp.ne.s32.totalorder %s600_s5, %s481_s4  ;;  %p485_p2 = scmp.lt.u32.totalorder %s481_s4, %s600_s5 }
 0x20b   :  { %p487_p3 = pnand %p485_p2, %p482_p1 }
 0x20d   :  { %490 = shalt.err (!%p487_p3)
}
 0x20e   :  { %296 = dma.vmem_to_hbm [thread:$0]  %s294_s8, 128, %s600_s5, [#allocation4]  }
 0x20f   :  { %495 = dma.done.wait [#allocation4], 128  }
 0x210   :  { %496 = vsyncadd [#allocation4], 4294967168 }
 0x211   :  { %300 = vsyncpa [#allocation3], 1 }
 0x212   :  { %301 = vsyncpa [#allocation6], 1 }
 0x213   :  { %302 = vsyncpa [#allocation4], 1 }

// kernel: tpu_custom_call.1
= control target key start
LH: loop header
LB: loop body
LE: loop exit
PB: predicated region body
PF: predicated region fallthrough
CT: control target
= control target key end

     0   :  { %8 = vsyncpa [#allocation4], 0  ;;  %s572_s0 = inlined_call_operand.hbm [shape: bf16[8,256], index: 0, kind: input, shape index: {}]   ;;  %s573_s1 = inlined_call_operand.hbm [shape: bf16[256,256], index: 1, kind: input, shape index: {}]   ;;  %s574_s2 = inlined_call_operand.vmem [shape: f32[1,256], index: 2, kind: input, shape index: {}]   ;;  %s575_s3 = inlined_call_operand.hbm [shape: bf16[8,256], index: 3, kind: output, shape index: {}]  }
   0x1   :  { %9 = vsyncpa [#allocation7], 0 }
   0x2   :  { %10 = vsyncpa [#allocation5], 0  ;;  %s501_s12 = smov [#allocation3]   ;;  %s502_s14 = smov [#allocation6]  }
   0x3   :  { %s17_s13 = sshll.u32 %s501_s12, 4  ;;  %s26_s15 = sshll.u32 %s502_s14, 4  ;;  %s18_s13 = int_to_ptr.vmem [resolvable:$true] %s17_s13  ;;  %s526_s15 = int_to_ptr.vmem [resolvable:$true] %s26_s15 }
   0x4   :  { %s429_s18 = scalar_lea.hbm %s572_s0, 128 }
   0x5   :  { %p430_p0 = scmp.ne.s32.totalorder %s572_s0, %s429_s18  ;;  %p433_p1 = scmp.lt.u32.totalorder %s429_s18, %s572_s0 }
   0x7   :  { %p435_p2 = pnand %p433_p1, %p430_p0 }
   0x9   :  { %438 = shalt.err (!%p435_p2)
}
   0xa   :  { %s439_s23 = scalar_lea.vmem %s18_s13, 128  ;;  %p444_p4 = scmp.lt.s32.totalorder %s18_s13, %s18_s13 }
   0xb   :  { %p440_p3 = scmp.ne.s32.totalorder %s18_s13, %s439_s23  ;;  %p445_p5 = scmp.lt.s32.totalorder %s439_s23, %s439_s23 }
   0xd   :  { %p446_p6 = por %p445_p5, %p444_p4 }
   0xf   :  { %p447_p7 = pnand %p446_p6, %p440_p3 }
  0x11   :  { %450 = shalt.err (!%p447_p7)
}
  0x12   :  { %20 = dma.hbm_to_vmem [thread:$0]  %s572_s0, 128, %s18_s13, [#allocation4]  }
  0x13   :  { %s451_s28 = scalar_lea.hbm %s573_s1, 4096 }
  0x14   :  { %p452_p8 = scmp.ne.s32.totalorder %s573_s1, %s451_s28  ;;  %p455_p9 = scmp.lt.u32.totalorder %s451_s28, %s573_s1 }
  0x16   :  { %p457_p10 = pnand %p455_p9, %p452_p8 }
  0x18   :  { %460 = shalt.err (!%p457_p10)
}
  0x19   :  { %s461_s6 = scalar_lea.vmem %s526_s15, 4096  ;;  %p466_p12 = scmp.lt.s32.totalorder %s526_s15, %s526_s15 }
  0x1a   :  { %p462_p11 = scmp.ne.s32.totalorder %s526_s15, %s461_s6  ;;  %p467_p13 = scmp.lt.s32.totalorder %s461_s6, %s461_s6 }
  0x1c   :  { %p468_p0 = por %p467_p13, %p466_p12 }
  0x1e   :  { %p469_p1 = pnand %p468_p0, %p462_p11 }
  0x20   :  { %472 = shalt.err (!%p469_p1)
}
  0x21   :  { %s503_s0 = smov 128   ;;  %s504_s7 = smov 8  }
  0x22   :  { %32 = dma.hbm_to_vmem [thread:$0]  %s573_s1, 4096, %s526_s15, [#allocation7], %s503_s0, %s503_s0, %s504_s7  }
  0x23   :  { %495 = dma.done.wait [#allocation4], 128  }
  0x24   :  { %496 = vsyncadd [#allocation4], 4294967168 }
  0x25   :  { %497 = dma.done.wait [#allocation7], 4096  }
  0x26   :  { %498 = vsyncadd [#allocation7], 4294963200  ;;  %v379_v0 = vld [vmem:[#allocation6 + $0x4] ss:$8 sps:$4 sm:$0xff]   ;;  %v381_v1 = vld [vmem:[#allocation6] ss:$8 sps:$4 sm:$0xff]   ;;  %v301_v35 = vlaneseq }
  0x27   :  { %249 = vmatprep.subr.bf16.mxu0 %v379_v0  ;;  %v382_v2 = vld [vmem:[#allocation6 + $0x14] ss:$8 sps:$4 sm:$0xff]   ;;  %v384_v3 = vld [vmem:[#allocation6 + $0x10] ss:$8 sps:$4 sm:$0xff]   ;;  %v385_v4 = vld [vmem:[#allocation6 + $0x24] ss:$8 sps:$4 sm:$0xff]  }
  0x28   :  { %250 = vmatpush1.bf16.msra.mxu0 %v381_v1  ;;  %v387_v5 = vld [vmem:[#allocation6 + $0x20] ss:$8 sps:$4 sm:$0xff]   ;;  %v388_v6 = vld [vmem:[#allocation6 + $0x34] ss:$8 sps:$4 sm:$0xff]   ;;  %v390_v7 = vld [vmem:[#allocation6 + $0x30] ss:$8 sps:$4 sm:$0xff]  }
  0x29   :  { %251 = vmatprep.subr.bf16.mxu0 %v382_v2  ;;  %v391_v8 = vld [vmem:[#allocation6 + $0x44] ss:$8 sps:$4 sm:$0xff]   ;;  %v393_v9 = vld [vmem:[#allocation6 + $0x40] ss:$8 sps:$4 sm:$0xff]   ;;  %v394_v10 = vld [vmem:[#allocation6 + $0x54] ss:$8 sps:$4 sm:$0xff]  }
  0x2a   :  { %v396_v11 = vld [vmem:[#allocation6 + $0x50] ss:$8 sps:$4 sm:$0xff]   ;;  %v397_v12 = vld [vmem:[#allocation6 + $0x64] ss:$8 sps:$4 sm:$0xff]   ;;  %v399_v15 = vld [vmem:[#allocation6 + $0x60] ss:$8 sps:$4 sm:$0xff]  }
  0x2b   :  { %v49_v13 = vld [vmem:[#allocation3] sm:$0xff]  ;;  %v403_v18 = vld [vmem:[#allocation6 + $0x84] ss:$8 sps:$4 sm:$0xff]   ;;  %v405_v19 = vld [vmem:[#allocation6 + $0x80] ss:$8 sps:$4 sm:$0xff]   ;;  %v302_v36 = vshrl.u32 %v301_v35, 7 }
  0x2c   :  { %252 = vmatpush1.bf16.msra.mxu0 %v384_v3  ;;  %v339_v14 = vcombine.high %v49_v13, %v49_v13  ;;  %v400_v16 = vld [vmem:[#allocation6 + $0x74] ss:$8 sps:$4 sm:$0xff]   ;;  %v402_v17 = vld [vmem:[#allocation6 + $0x70] ss:$8 sps:$4 sm:$0xff]   ;;  %v409_v22 = vld [vmem:[#allocation6 + $0xa4] ss:$8 sps:$4 sm:$0xff]   ;;  %v338_v34 = vcombine.low %v49_v13, %v49_v13 }
  0x2d   :  { %253 = vmatprep.subr.bf16.mxu0 %v385_v4  ;;  %v406_v20 = vld [vmem:[#allocation6 + $0x94] ss:$8 sps:$4 sm:$0xff]   ;;  %v408_v21 = vld [vmem:[#allocation6 + $0x90] ss:$8 sps:$4 sm:$0xff]   ;;  %v411_v23 = vld [vmem:[#allocation6 + $0xa0] ss:$8 sps:$4 sm:$0xff]  }
  0x2e   :  { %281 = vmatprep.mubr.bf16.mxu0 %v339_v14  ;;  %v412_v24 = vld [vmem:[#allocation6 + $0xb4] ss:$8 sps:$4 sm:$0xff]   ;;  %v414_v25 = vld [vmem:[#allocation6 + $0xb0] ss:$8 sps:$4 sm:$0xff]   ;;  %v415_v26 = vld [vmem:[#allocation6 + $0xc4] ss:$8 sps:$4 sm:$0xff]  }
  0x2f   :  { %v417_v27 = vld [vmem:[#allocation6 + $0xc0] ss:$8 sps:$4 sm:$0xff]   ;;  %v418_v28 = vld [vmem:[#allocation6 + $0xd4] ss:$8 sps:$4 sm:$0xff]   ;;  %v420_v29 = vld [vmem:[#allocation6 + $0xd0] ss:$8 sps:$4 sm:$0xff]  }
  0x30   :  { %254 = vmatpush1.bf16.msra.mxu0 %v387_v5  ;;  %v421_v30 = vld [vmem:[#allocation6 + $0xe4] ss:$8 sps:$4 sm:$0xff]   ;;  %v423_v31 = vld [vmem:[#allocation6 + $0xe0] ss:$8 sps:$4 sm:$0xff]   ;;  %v424_v32 = vld [vmem:[#allocation6 + $0xf4] ss:$8 sps:$4 sm:$0xff]  }
  0x31   :  { %255 = vmatprep.subr.bf16.mxu0 %v388_v6  ;;  %v426_v33 = vld [vmem:[#allocation6 + $0xf0] ss:$8 sps:$4 sm:$0xff]   ;;  %v303_v37 = vsub.s32 0, %v302_v36  ;;  %v307_v39 = vsub.s32 1, %v302_v36  ;;  %s505_s11 = smov [#allocation8]  }
  0x32   :  { %v299_v38 = vld [vmem:[%s574_s2] sm:$0x3]  ;;  %s328_s12 = sshll.u32 %s505_s11, 4  ;;  %s329_s12 = int_to_ptr.vmem [resolvable:$true] %s328_s12 }
  0x33   :  { %v304_v40 = vrot.slane %v299_v38, %v303_v37  ;;  %v308_v41 = vrot.slane %v299_v38, %v307_v39  ;;  %s473_s13 = scalar_lea.vmem %s329_s12, 128  ;;  %p478_p3 = scmp.lt.s32.totalorder %s329_s12, %s329_s12 }
  0x34   :  { %256 = vmatpush1.bf16.msra.mxu0 %v390_v7  ;;  %p474_p2 = scmp.ne.s32.totalorder %s329_s12, %s473_s13  ;;  %p479_p4 = scmp.lt.s32.totalorder %s473_s13, %s473_s13 }
  0x35   :  { %257 = vmatprep.subr.bf16.mxu0 %v391_v8 }
  0x36   :  { %p480_p5 = por %p479_p4, %p478_p3 }
  0x38   :  { %258 = vmatpush1.bf16.msra.mxu0 %v393_v9  ;;  %p481_p6 = pnand %p480_p5, %p474_p2 }
  0x39   :  { %259 = vmatprep.subr.bf16.mxu0 %v394_v10 }
  0x3c   :  { %260 = vmatpush1.bf16.msra.mxu0 %v396_v11 }
  0x3d   :  { %261 = vmatprep.subr.bf16.mxu0 %v397_v12 }
  0x40   :  { %262 = vmatpush1.bf16.msra.mxu0 %v399_v15 }
  0x41   :  { %263 = vmatprep.subr.bf16.mxu0 %v400_v16 }
  0x44   :  { %264 = vmatpush1.bf16.msra.mxu0 %v402_v17 }
  0x45   :  { %265 = vmatprep.subr.bf16.mxu0 %v403_v18 }
  0x48   :  { %266 = vmatpush1.bf16.msra.mxu0 %v405_v19 }
  0x49   :  { %267 = vmatprep.subr.bf16.mxu0 %v406_v20 }
  0x4c   :  { %268 = vmatpush1.bf16.msra.mxu0 %v408_v21 }
  0x4d   :  { %269 = vmatprep.subr.bf16.mxu0 %v409_v22 }
  0x50   :  { %270 = vmatpush1.bf16.msra.mxu0 %v411_v23 }
  0x51   :  { %271 = vmatprep.subr.bf16.mxu0 %v412_v24 }
  0x54   :  { %272 = vmatpush1.bf16.msra.mxu0 %v414_v25 }
  0x55   :  { %273 = vmatprep.subr.bf16.mxu0 %v415_v26 }
  0x58   :  { %274 = vmatpush1.bf16.msra.mxu0 %v417_v27 }
  0x59   :  { %275 = vmatprep.subr.bf16.mxu0 %v418_v28 }
  0x5c   :  { %276 = vmatpush1.bf16.msra.mxu0 %v420_v29 }
  0x5d   :  { %277 = vmatprep.subr.bf16.mxu0 %v421_v30 }
  0x60   :  { %278 = vmatpush1.bf16.msra.mxu0 %v423_v31 }
  0x61   :  { %279 = vmatprep.subr.bf16.mxu0 %v424_v32 }
  0x64   :  { %280 = vmatpush1.bf16.msra.mxu0 %v426_v33 }
  0x67   :  { %282 = vmatmul.mubr.bf16.vlgmr.msra.gmra.mrb[0].mxu0 %v338_v34 }
 0x13a   :  { %v283_v42 = vpop.f32.mrb[0].mxu0 }
 0x13b   :  { %v311_v43 = vadd.f32 %v304_v40, %v283_v42  ;;  %v285_v44 = vpop.f32.mrb[1].mxu0 }
 0x13c   :  { %v312_v45 = vadd.f32 %v308_v41, %v285_v44  ;;  %v287_v46 = vpop.f32.mrb[2].mxu0 }
 0x13d   :  { %v288_v47 = vpop.f32.mrb[3].mxu0 }
 0x13e   :  { %v373_v48 = vpack.c.bf16 %v312_v45, %v311_v43 }
 0x140   :  { %321 = vst [vmem:[#allocation8] sm:$0xff] %v373_v48 }
 0x141   :  { %484 = shalt.err (!%p481_p6)
}
 0x142   :  { %s485_s15 = scalar_lea.hbm %s575_s3, 128 }
 0x143   :  { %p486_p7 = scmp.ne.s32.totalorder %s575_s3, %s485_s15  ;;  %p489_p8 = scmp.lt.u32.totalorder %s485_s15, %s575_s3 }
 0x145   :  { %p491_p9 = pnand %p489_p8, %p486_p7 }
 0x147   :  { %494 = shalt.err (!%p491_p9)
}
 0x148   :  { %331 = dma.vmem_to_hbm [thread:$0]  %s329_s12, 128, %s575_s3, [#allocation5]  }
 0x149   :  { %499 = dma.done.wait [#allocation5], 128  }
 0x14a   :  { %500 = vsyncadd [#allocation5], 4294967168 }
 0x14b   :  { %335 = vsyncpa [#allocation4], 1 }
 0x14c   :  { %336 = vsyncpa [#allocation7], 1 }
 0x14d   :  { %337 = vsyncpa [#allocation5], 1 }

</bundles_post_ra>
